<compile_context>
chip_gen: v7x
topology: tpu7x:2x2x1
jax: 0.10.0
libtpu: 0.0.40
codegen_flags: <defaults>
</compile_context>

<pallas_src>
import math

import jax
import jax.numpy as jnp
from jax.experimental import pallas as pl
from jax.experimental.pallas import tpu as pltpu

_A = math.sqrt(2.0 / math.pi)          # sqrt(2/pi)
_B = _A * 0.044715                     # folded GELU constant


def _mlp_kernel(x_ref, wfc_ref, bfc_ref, wproj_ref, bproj_ref, o_ref):
    """One row-tile per grid step: (block_rows, C) -> (block_rows, C).

    x_ref     : (block_rows, C)   bf16
    wfc_ref   : (C, H)            bf16  (resident, single-buffered)
    bfc_ref   : (1, H)            f32   (resident, single-buffered)
    wproj_ref : (H, C)            bf16  (resident, single-buffered)
    bproj_ref : (1, C)            f32   (resident, single-buffered)
    o_ref     : (block_rows, C)   f32
    """
    # c_fc: bf16 MXU matmul, f32 accumulation, f32 bias epilogue.
    h = jnp.dot(x_ref[...], wfc_ref[...], preferred_element_type=jnp.float32)
    h = h + bfc_ref[...]

    # NewGELU (exact OpenAI tanh form), constants folded:
    #   0.5 * h * (1 + tanh(h * (A + B*h^2)))        ; tanh issues on the EUP slot.
    t = jnp.tanh(h * (_A + _B * (h * h)))
    h = 0.5 * h * (1.0 + t)

    # c_proj: bf16 MXU matmul, f32 accumulation, f32 bias epilogue.
    out = jnp.dot(h.astype(jnp.bfloat16), wproj_ref[...],
                  preferred_element_type=jnp.float32)
    o_ref[...] = (out + bproj_ref[...]).astype(o_ref.dtype)


def _device_defaults():
    """(target_rows, row_align, vmem_limit_bytes) per TPU generation."""
    kind = ""
    try:
        kind = jax.devices()[0].device_kind.lower()
    except Exception:
        pass
    if "v7" in kind:
        # 64 MiB physical VMEM, 2 TCs: conservative limit, 128-aligned rows, even grid.
        return 256, 128, 48 * 1024 * 1024
    if "v6" in kind:
        # 128 MiB VMEM, 2x256^2 MXU: large row tiles, generous scoped limit.
        return 512, 256, 64 * 1024 * 1024
    if "v5" in kind:
        # 4x128^2 MXU, compute-bound: 128-row granularity, 256 rows is enough.
        return 256, 128, 64 * 1024 * 1024
    # Unknown backend: safe conservative settings.
    return 256, 128, 48 * 1024 * 1024


def _pick_block_rows(N, target_rows, row_align):
    """Pick a row-tile size. Returns (block_rows, divides_N)."""
    target = max(8, min(target_rows, N))
    divisors = [c for c in range(8, target + 1, 8) if N % c == 0]
    if divisors:
        def key(c):
            n_blocks = N // c
            return (n_blocks % 2,                       # prefer even grid (v7x megacore)
                    0 if c % row_align == 0 else 1,     # prefer full MXU M passes
                    -c)                                 # then the biggest tile
        return min(divisors, key=key), True
    # Nothing divides N: fall back to a padded aligned tile.
    return max(8, -(-min(target_rows, N) // 8) * 8), False


def mlp(x, w_fc, b_fc, w_proj, b_proj, *, block_rows=None, vmem_limit_bytes=None):
    """Fused MLP forward.  x: (B, T, C); w_fc: (C, 4C); w_proj: (4C, C)."""
    B, T, C = x.shape
    H = w_fc.shape[1]
    assert w_fc.shape == (C, H) and w_proj.shape == (H, C)
    b_fc = jnp.asarray(b_fc).reshape(1, H)
    b_proj = jnp.asarray(b_proj).reshape(1, C)

    N = B * T
    target_rows, row_align, default_vmem = _device_defaults()
    if vmem_limit_bytes is None:
        vmem_limit_bytes = default_vmem
    if block_rows is None:
        block_rows, divides = _pick_block_rows(N, target_rows, row_align)
    else:
        block_rows = max(8, -(-block_rows // 8) * 8)
        divides = (N % block_rows == 0)

    n_blocks = pl.cdiv(N, block_rows)
    Np = n_blocks * block_rows

    # Activations cross the boundary in bf16 (half the DMA bytes, no in-kernel cast);
    # weights travel in bf16 (full-rate MXU); biases stay f32 for the f32 epilogue.
    x2 = x.reshape(N, C).astype(jnp.bfloat16)
    if not divides:
        # TODO(synk): replace with an in-kernel ragged-row guard to avoid this HBM copy.
        x2 = jnp.pad(x2, ((0, Np - N), (0, 0)))
    w_fc_b = w_fc.astype(jnp.bfloat16)
    w_proj_b = w_proj.astype(jnp.bfloat16)

    cost = pl.CostEstimate(
        flops=4 * N * C * H + 8 * N * H,            # two matmuls + GELU elementwise
        transcendentals=N * H,                      # one tanh per hidden element
        bytes_accessed=N * C * 2 + N * C * 4        # x bf16 in, out f32
                       + 2 * C * H * 2              # both weight matrices in bf16
                       + (H + C) * 4,               # biases in f32
    )

    def build_call(single_buffer_weights):
        def resident_spec(shape):
            if single_buffer_weights:
                # Constant index_map -> a second pipeline buffer is pure VMEM waste.
                return pl.BlockSpec(shape, lambda i: (0, 0),
                                    pipeline_mode=pl.Buffered(1))
            return pl.BlockSpec(shape, lambda i: (0, 0))

        return pl.pallas_call(
            _mlp_kernel,
            out_shape=jax.ShapeDtypeStruct((Np, C), jnp.float32),
            grid_spec=pltpu.PrefetchScalarGridSpec(
                num_scalar_prefetch=0,
                grid=(n_blocks,),
                in_specs=[
                    pl.BlockSpec((block_rows, C), lambda i: (i, 0)),   # x rows (pipelined)
                    resident_spec((C, H)),                             # W_fc
                    resident_spec((1, H)),                             # b_fc
                    resident_spec((H, C)),                             # W_proj
                    resident_spec((1, C)),                             # b_proj
                ],
                out_specs=pl.BlockSpec((block_rows, C), lambda i: (i, 0)),
            ),
            compiler_params=pltpu.CompilerParams(
                dimension_semantics=("parallel",),
                vmem_limit_bytes=vmem_limit_bytes,
            ),
            cost_estimate=cost,
        )

    try:
        out = build_call(True)(x2, w_fc_b, b_fc, w_proj_b, b_proj)
    except Exception:
        # Fallback: default (double) buffering if Buffered(1) is rejected by this backend.
        out = build_call(False)(x2, w_fc_b, b_fc, w_proj_b, b_proj)

    if Np != N:
        out = out[:N]
    return out.reshape(B, T, C).astype(x.dtype)


def reference(x, w_fc, b_fc, w_proj, b_proj):
    """Plain-JAX f32 reference reproducing the PyTorch MLP forward."""
    h = x @ w_fc + b_fc.reshape(-1)
    h = 0.5 * h * (1.0 + jnp.tanh(_A * (h + 0.044715 * (h ** 3))))
    return h @ w_proj + b_proj.reshape(-1)


if __name__ == "__main__":
    # config: n_embd=32 -> hidden 4*n_embd=128; batch=2, seq=8
    B, T, C = 2, 8, 32
    H = 4 * C

    key = jax.random.PRNGKey(0)
    kx, k1, k2, k3, k4 = jax.random.split(key, 5)

    x = jax.random.normal(kx, (B, T, C), dtype=jnp.float32)
    w_fc = jax.random.normal(k1, (C, H), dtype=jnp.float32) * 0.02
    b_fc = jax.random.normal(k2, (1, H), dtype=jnp.float32) * 0.02
    w_proj = jax.random.normal(k3, (H, C), dtype=jnp.float32) * 0.02
    b_proj = jax.random.normal(k4, (1, C), dtype=jnp.float32) * 0.02

    out = mlp(x, w_fc, b_fc, w_proj, b_proj)   # N=16 -> block_rows=8, grid=(2,)
    out = jax.block_until_ready(out)

    ref = reference(x, w_fc, b_fc, w_proj, b_proj)
    # bf16 matmul inputs with f32 accumulation -> loosened tolerance vs the f32 reference.
    assert jnp.allclose(out, ref, atol=1e-2, rtol=1e-2), "mismatch vs reference"

    print("KERNEL_OK")
</pallas_src>

<mosaic_0001>
module attributes {stable_mosaic.version = 11 : i64} {
  func.func @_mlp_kernel(%arg0: i32, %arg1: memref<8x32xbf16, #tpu.memory_space<vmem>>, %arg2: memref<32x128xbf16, #tpu.memory_space<vmem>>, %arg3: memref<1x128xf32, #tpu.memory_space<vmem>>, %arg4: memref<128x32xbf16, #tpu.memory_space<vmem>>, %arg5: memref<1x32xf32, #tpu.memory_space<vmem>>, %arg6: memref<8x32xf32, #tpu.memory_space<vmem>>) attributes {dimension_semantics = [#tpu.dimension_semantics<parallel>], iteration_bounds = array<i64: 2>, scalar_prefetch = 0 : i64, scratch_operands = 0 : i64, tpu.core_type = #tpu.core_type<tc>, window_params = [{transform_indices = @transform_0, window_bounds = array<i64: 8, 32>}, {pipeline_mode = #tpu.pipeline_mode<synchronous>, transform_indices = @transform_1, window_bounds = array<i64: 32, 128>}, {pipeline_mode = #tpu.pipeline_mode<synchronous>, transform_indices = @transform_2, window_bounds = array<i64: 1, 128>}, {pipeline_mode = #tpu.pipeline_mode<synchronous>, transform_indices = @transform_3, window_bounds = array<i64: 128, 32>}, {pipeline_mode = #tpu.pipeline_mode<synchronous>, transform_indices = @transform_4, window_bounds = array<i64: 1, 32>}, {transform_indices = @transform_5, window_bounds = array<i64: 8, 32>}]} {
    %c0 = arith.constant 0 : index
    %c0_0 = arith.constant 0 : index
    %0 = vector.load %arg1[%c0, %c0_0] : memref<8x32xbf16, #tpu.memory_space<vmem>>, vector<8x32xbf16>
    %c0_1 = arith.constant 0 : index
    %c0_2 = arith.constant 0 : index
    %1 = vector.load %arg2[%c0_1, %c0_2] : memref<32x128xbf16, #tpu.memory_space<vmem>>, vector<32x128xbf16>
    %cst = arith.constant dense<0.000000e+00> : vector<8x128xf32>
    %2 = tpu.matmul %0, %1, %cst {dimension_numbers = #tpu.dot_dimension_numbers<[1], [0], [0], [1], [0, 0, 1, 1], [], []>} : vector<8x32xbf16>, vector<32x128xbf16>, vector<8x128xf32> -> vector<8x128xf32>
    %c0_3 = arith.constant 0 : index
    %c0_4 = arith.constant 0 : index
    %3 = vector.load %arg3[%c0_3, %c0_4] : memref<1x128xf32, #tpu.memory_space<vmem>>, vector<1x128xf32>
    %4 = vector.broadcast %3 : vector<1x128xf32> to vector<8x128xf32>
    %5 = arith.addf %2, %4 : vector<8x128xf32>
    %6 = arith.mulf %5, %5 : vector<8x128xf32>
    %cst_5 = arith.constant 0.0356774069 : f32
    %7 = vector.broadcast %cst_5 : f32 to vector<8x128xf32>
    %8 = arith.mulf %7, %6 : vector<8x128xf32>
    %cst_6 = arith.constant 0.797884583 : f32
    %9 = vector.broadcast %cst_6 : f32 to vector<8x128xf32>
    %10 = arith.addf %9, %8 : vector<8x128xf32>
    %11 = arith.mulf %5, %10 : vector<8x128xf32>
    %12 = math.tanh %11 : vector<8x128xf32>
    %cst_7 = arith.constant 5.000000e-01 : f32
    %13 = vector.broadcast %cst_7 : f32 to vector<8x128xf32>
    %14 = arith.mulf %13, %5 : vector<8x128xf32>
    %cst_8 = arith.constant 1.000000e+00 : f32
    %15 = vector.broadcast %cst_8 : f32 to vector<8x128xf32>
    %16 = arith.addf %15, %12 : vector<8x128xf32>
    %17 = arith.mulf %14, %16 : vector<8x128xf32>
    %18 = arith.truncf %17 : vector<8x128xf32> to vector<8x128xbf16>
    %c0_9 = arith.constant 0 : index
    %c0_10 = arith.constant 0 : index
    %19 = vector.load %arg4[%c0_9, %c0_10] : memref<128x32xbf16, #tpu.memory_space<vmem>>, vector<128x32xbf16>
    %cst_11 = arith.constant dense<0.000000e+00> : vector<8x32xf32>
    %20 = tpu.matmul %18, %19, %cst_11 {dimension_numbers = #tpu.dot_dimension_numbers<[1], [0], [0], [1], [0, 0, 1, 1], [], []>} : vector<8x128xbf16>, vector<128x32xbf16>, vector<8x32xf32> -> vector<8x32xf32>
    %c0_12 = arith.constant 0 : index
    %c0_13 = arith.constant 0 : index
    %21 = vector.load %arg5[%c0_12, %c0_13] : memref<1x32xf32, #tpu.memory_space<vmem>>, vector<1x32xf32>
    %22 = vector.broadcast %21 : vector<1x32xf32> to vector<8x32xf32>
    %23 = arith.addf %20, %22 : vector<8x32xf32>
    %c0_14 = arith.constant 0 : index
    %c0_15 = arith.constant 0 : index
    %24 = vector.load %arg6[%c0_14, %c0_15] : memref<8x32xf32, #tpu.memory_space<vmem>>, vector<8x32xf32>
    tpu.vector_store %arg6[%c0_14, %c0_15], %23 {strides = array<i32>} : memref<8x32xf32, #tpu.memory_space<vmem>>, vector<8x32xf32>,
    return
  }
  func.func @transform_0(%arg0: i32) -> (i32, i32) {
    %c0_i32 = arith.constant 0 : i32
    %c0_i32_0 = arith.constant 0 : i32
    return %arg0, %c0_i32 : i32, i32
  }
  func.func @transform_1(%arg0: i32) -> (i32, i32) {
    %c0_i32 = arith.constant 0 : i32
    %c0_i32_0 = arith.constant 0 : i32
    %c0_i32_1 = arith.constant 0 : i32
    return %c0_i32, %c0_i32_0 : i32, i32
  }
  func.func @transform_2(%arg0: i32) -> (i32, i32) {
    %c0_i32 = arith.constant 0 : i32
    %c0_i32_0 = arith.constant 0 : i32
    %c0_i32_1 = arith.constant 0 : i32
    return %c0_i32, %c0_i32_0 : i32, i32
  }
  func.func @transform_3(%arg0: i32) -> (i32, i32) {
    %c0_i32 = arith.constant 0 : i32
    %c0_i32_0 = arith.constant 0 : i32
    %c0_i32_1 = arith.constant 0 : i32
    return %c0_i32, %c0_i32_0 : i32, i32
  }
  func.func @transform_4(%arg0: i32) -> (i32, i32) {
    %c0_i32 = arith.constant 0 : i32
    %c0_i32_0 = arith.constant 0 : i32
    %c0_i32_1 = arith.constant 0 : i32
    return %c0_i32, %c0_i32_0 : i32, i32
  }
  func.func @transform_5(%arg0: i32) -> (i32, i32) {
    %c0_i32 = arith.constant 0 : i32
    %c0_i32_0 = arith.constant 0 : i32
    return %arg0, %c0_i32 : i32, i32
  }
}

module attributes {stable_mosaic.version = 11 : i64} {
  func.func @_mlp_kernel(%arg0: i32, %arg1: memref<8x32xbf16, #tpu.memory_space<vmem>>, %arg2: memref<32x128xbf16, #tpu.memory_space<vmem>>, %arg3: memref<1x128xf32, #tpu.memory_space<vmem>>, %arg4: memref<128x32xbf16, #tpu.memory_space<vmem>>, %arg5: memref<1x32xf32, #tpu.memory_space<vmem>>, %arg6: memref<8x32xf32, #tpu.memory_space<vmem>>) attributes {dimension_semantics = [#tpu.dimension_semantics<parallel>], iteration_bounds = array<i64: 2>, scalar_prefetch = 0 : i64, scratch_operands = 0 : i64, tpu.core_type = #tpu.core_type<tc>, window_params = [{transform_indices = @transform_0, window_bounds = array<i64: 8, 32>}, {pipeline_mode = #tpu.pipeline_mode<synchronous>, transform_indices = @transform_1, window_bounds = array<i64: 32, 128>}, {pipeline_mode = #tpu.pipeline_mode<synchronous>, transform_indices = @transform_2, window_bounds = array<i64: 1, 128>}, {pipeline_mode = #tpu.pipeline_mode<synchronous>, transform_indices = @transform_3, window_bounds = array<i64: 128, 32>}, {pipeline_mode = #tpu.pipeline_mode<synchronous>, transform_indices = @transform_4, window_bounds = array<i64: 1, 32>}, {transform_indices = @transform_5, window_bounds = array<i64: 8, 32>}]} {
    %c0 = arith.constant 0 : index
    %c0_0 = arith.constant 0 : index
    %0 = vector.load %arg1[%c0, %c0_0] : memref<8x32xbf16, #tpu.memory_space<vmem>>, vector<8x32xbf16>
    %c0_1 = arith.constant 0 : index
    %c0_2 = arith.constant 0 : index
    %1 = vector.load %arg2[%c0_1, %c0_2] : memref<32x128xbf16, #tpu.memory_space<vmem>>, vector<32x128xbf16>
    %cst = arith.constant dense<0.000000e+00> : vector<8x128xf32>
    %2 = tpu.matmul %0, %1, %cst {dimension_numbers = #tpu.dot_dimension_numbers<[1], [0], [0], [1], [0, 0, 1, 1], [], []>} : vector<8x32xbf16>, vector<32x128xbf16>, vector<8x128xf32> -> vector<8x128xf32>
    %c0_3 = arith.constant 0 : index
    %c0_4 = arith.constant 0 : index
    %3 = vector.load %arg3[%c0_3, %c0_4] : memref<1x128xf32, #tpu.memory_space<vmem>>, vector<1x128xf32>
    %4 = vector.broadcast %3 : vector<1x128xf32> to vector<8x128xf32>
    %5 = arith.addf %2, %4 : vector<8x128xf32>
    %6 = arith.mulf %5, %5 : vector<8x128xf32>
    %cst_5 = arith.constant 0.0356774069 : f32
    %7 = vector.broadcast %cst_5 : f32 to vector<8x128xf32>
    %8 = arith.mulf %7, %6 : vector<8x128xf32>
    %cst_6 = arith.constant 0.797884583 : f32
    %9 = vector.broadcast %cst_6 : f32 to vector<8x128xf32>
    %10 = arith.addf %9, %8 : vector<8x128xf32>
    %11 = arith.mulf %5, %10 : vector<8x128xf32>
    %12 = math.tanh %11 : vector<8x128xf32>
    %cst_7 = arith.constant 5.000000e-01 : f32
    %13 = vector.broadcast %cst_7 : f32 to vector<8x128xf32>
    %14 = arith.mulf %13, %5 : vector<8x128xf32>
    %cst_8 = arith.constant 1.000000e+00 : f32
    %15 = vector.broadcast %cst_8 : f32 to vector<8x128xf32>
    %16 = arith.addf %15, %12 : vector<8x128xf32>
    %17 = arith.mulf %14, %16 : vector<8x128xf32>
    %18 = arith.truncf %17 : vector<8x128xf32> to vector<8x128xbf16>
    %c0_9 = arith.constant 0 : index
    %c0_10 = arith.constant 0 : index
    %19 = vector.load %arg4[%c0_9, %c0_10] : memref<128x32xbf16, #tpu.memory_space<vmem>>, vector<128x32xbf16>
    %cst_11 = arith.constant dense<0.000000e+00> : vector<8x32xf32>
    %20 = tpu.matmul %18, %19, %cst_11 {dimension_numbers = #tpu.dot_dimension_numbers<[1], [0], [0], [1], [0, 0, 1, 1], [], []>} : vector<8x128xbf16>, vector<128x32xbf16>, vector<8x32xf32> -> vector<8x32xf32>
    %c0_12 = arith.constant 0 : index
    %c0_13 = arith.constant 0 : index
    %21 = vector.load %arg5[%c0_12, %c0_13] : memref<1x32xf32, #tpu.memory_space<vmem>>, vector<1x32xf32>
    %22 = vector.broadcast %21 : vector<1x32xf32> to vector<8x32xf32>
    %23 = arith.addf %20, %22 : vector<8x32xf32>
    %c0_14 = arith.constant 0 : index
    %c0_15 = arith.constant 0 : index
    %24 = vector.load %arg6[%c0_14, %c0_15] : memref<8x32xf32, #tpu.memory_space<vmem>>, vector<8x32xf32>
    tpu.vector_store %arg6[%c0_14, %c0_15], %23 {strides = array<i32>} : memref<8x32xf32, #tpu.memory_space<vmem>>, vector<8x32xf32>,
    return
  }
  func.func @transform_0(%arg0: i32) -> (i32, i32) {
    %c0_i32 = arith.constant 0 : i32
    %c0_i32_0 = arith.constant 0 : i32
    return %arg0, %c0_i32 : i32, i32
  }
  func.func @transform_1(%arg0: i32) -> (i32, i32) {
    %c0_i32 = arith.constant 0 : i32
    %c0_i32_0 = arith.constant 0 : i32
    %c0_i32_1 = arith.constant 0 : i32
    return %c0_i32, %c0_i32_0 : i32, i32
  }
  func.func @transform_2(%arg0: i32) -> (i32, i32) {
    %c0_i32 = arith.constant 0 : i32
    %c0_i32_0 = arith.constant 0 : i32
    %c0_i32_1 = arith.constant 0 : i32
    return %c0_i32, %c0_i32_0 : i32, i32
  }
  func.func @transform_3(%arg0: i32) -> (i32, i32) {
    %c0_i32 = arith.constant 0 : i32
    %c0_i32_0 = arith.constant 0 : i32
    %c0_i32_1 = arith.constant 0 : i32
    return %c0_i32, %c0_i32_0 : i32, i32
  }
  func.func @transform_4(%arg0: i32) -> (i32, i32) {
    %c0_i32 = arith.constant 0 : i32
    %c0_i32_0 = arith.constant 0 : i32
    %c0_i32_1 = arith.constant 0 : i32
    return %c0_i32, %c0_i32_0 : i32, i32
  }
  func.func @transform_5(%arg0: i32) -> (i32, i32) {
    %c0_i32 = arith.constant 0 : i32
    %c0_i32_0 = arith.constant 0 : i32
    return %arg0, %c0_i32 : i32, i32
  }
}

</mosaic_0001>

<bundles_post_ra>
// kernel: tpu_custom_call.1
= control target key start
LH: loop header
LB: loop body
LE: loop exit
PB: predicated region body
PF: predicated region fallthrough
CT: control target
= control target key end

     0   :  { %10 = vsyncpa [#allocation3], 0  ;;  %s834_s0 = inlined_call_operand.vmem [shape: bf16[16,32], index: 0, kind: input, shape index: {}]   ;;  %s835_s1 = inlined_call_operand.vmem [shape: bf16[32,128], index: 1, kind: input, shape index: {}]   ;;  %s836_s2 = inlined_call_operand.vmem [shape: f32[1,128], index: 2, kind: input, shape index: {}]   ;;  %s837_s3 = inlined_call_operand.vmem [shape: bf16[128,32], index: 3, kind: input, shape index: {}]   ;;  %s838_s4 = inlined_call_operand.vmem [shape: f32[1,32], index: 4, kind: input, shape index: {}]   ;;  %s839_s5 = inlined_call_operand.hbm [shape: f32[16,32], index: 5, kind: output, shape index: {}]  }
   0x1   :  { %12 = vsyncpa [#allocation3 + $0x1], 0  ;;  %s696_s18 = smov 0   ;;  %s698_s19 = smov 0  }
   0x2   :  { %s700_s20 = smov 0   ;;  %s702_s21 = smov 0  }
   0x3 LB: > { %s717_s22 = sadd.s32 4294967295, %s661_s21   ;;  %s483_s23 = sadd.s32 4294967294, %s661_s21   ;;  %s661_s21 = sphi %s702_s21, %s845_s21   ;;  %s657_s20 = sphi %s700_s20, %s844_s20   ;;  %s653_s19 = sphi %s698_s19, %s843_s19   ;;  %s649_s18 = sphi %s696_s18, %s842_s18  }
   0x4   : > { %s721_s24 = sadd.s32 1, %s661_s21   ;;  %s135_s25 = sadd.s32 1, %s657_s20 }
   0x5   : > { %s132_s26 = ssub.s32 %s661_s21, %s721_s24  ;;  %p145_p0 = scmp.ne.s32.totalorder %s657_s20, %s653_s19 }
   0x6   : > { %p133_p1 = scmp.eq.s32.totalorder %s132_s26, 0  ;;  %p146_p2 = scmp.eq.s32.totalorder %s717_s22, 1 }
   0x7   : > { %p151_p3 = scmp.ne.s32.totalorder %s653_s19, %s649_s18  ;;  %p152_p4 = scmp.eq.s32.totalorder %s483_s23, 1 }
   0x8   : > { %s732_s27 = scalar_select %p133_p1, %s657_s20, %s135_s25  }
   0x9   : > { %p734_p5 = por %p146_p2, %p145_p0  ;;  %p738_p6 = por %p152_p4, %p151_p3 }
   0xa   : > { %p486_p7 = scmp.ge.s32.totalorder %s661_s21, 1  ;;  %p189_p8 = scmp.lt.s32.totalorder %s661_s21, 3 }
   0xc   : > { %p190_p9 = pnand %p486_p7, %p189_p8 }
   0xd   : > { %v587_v0 = vld [vmem:[%s835_s1] sm:$0xff] (!%p190_p9)   ;;  %v663_v1 = vmov (!%p190_p9), 0.0   ;;  %v588_v2 = vld [vmem:[%s835_s1 + $0x8] sm:$0xff] (!%p190_p9)   ;;  %vm664_vm0 = vmmov (!%p190_p9), 0   ;;  %p216_p10 = scmp.lt.s32.totalorder (!%p190_p9), %s717_s22, 1  ;;  %vm245_vm1 = vcmask (!%p190_p9), 261120  }
   0xe   : > { %193 = sbr.rel (%p190_p9) target bundleno = 493 (0x1ed), region = 40  ;;  %518 = vmatprep.subr.bf16.mxu0 (!%p190_p9), %v663_v1  ;;  %526 = vmatprep.subr.bf16.mxu1 (!%p190_p9), %v663_v1  ;;  %v589_v3 = vld [vmem:[%s837_s3] sm:$0xff] (!%p190_p9)   ;;  %v590_v5 = vld [vmem:[%s837_s3 + $0x8] sm:$0xff] (!%p190_p9)   ;;  %v591_v6 = vld [vmem:[%s837_s3 + $0x10] sm:$0xff] (!%p190_p9)   ;;  %s213_s16 = sand.u32 (!%p190_p9), 1, %s653_s19  }
   0xf   : > { %519 = vmatpush3.bf16.msra.mxu0 (!%p190_p9), %v587_v0  ;;  %522 = vmatprep.mubr.msk.bf16.mxu0 (!%p190_p9), %vm664_vm0, %v663_v1  ;;  %v592_v7 = vld [vmem:[%s837_s3 + $0x18] sm:$0xff] (!%p190_p9)   ;;  %v593_v8 = vld [vmem:[%s837_s3 + $0x20] sm:$0xff] (!%p190_p9)   ;;  %v594_v9 = vld [vmem:[%s837_s3 + $0x28] sm:$0xff] (!%p190_p9)   ;;  %s487_s17 = sshll.u32 (!%p190_p9), %s213_s16, 3  ;;  %s503_s26 = sshll.u32 (!%p190_p9), %s717_s22, 7 }
  0x10   : > { %520 = vmatprep.subr.bf16.mxu0 (!%p190_p9), %v663_v1  ;;  %542 = vmatprep.mubr.msk.bf16.mxu1 (!%p190_p9), %vm664_vm0, %v663_v1  ;;  %v595_v10 = vld [vmem:[%s837_s3 + $0x30] sm:$0xff] (!%p190_p9)   ;;  %v596_v11 = vld [vmem:[%s837_s3 + $0x38] sm:$0xff] (!%p190_p9)   ;;  %v489_v12 = vld [vmem:[%s836_s2] ss:$0 sm:$0xff] (!%p190_p9)  ;;  %s215_s30 = scalar_lea.vmem (!%p190_p9), [#allocation2], %s487_s17  ;;  %s791_s9 = scalar_lea.hbm (!%p190_p9), %s839_s5, %s503_s26 }
  0x11   : > { %527 = vmatpush3.bf16.msra.mxu1 (!%p190_p9), %v589_v3  ;;  %v493_v27 = vld [vmem:[%s838_s4] ss:$0 sm:$0xff] (!%p190_p9)  ;;  %s424_s6 = sshll.u32 (!%p190_p9), %s215_s30, 4  ;;  %s793_s6 = int_to_ptr.vmem [resolvable:$true] %s424_s6 }
  0x12   : > { %528 = vmatprep.subr.bf16.mxu1 (!%p190_p9), %v663_v1  ;;  %s599_s10 = scalar_lea.vmem (!%p190_p9), %s793_s6, 128 }
  0x13   : > { %521 = vmatpush3.bf16.msra.mxu0 (!%p190_p9), %v588_v2  ;;  %p600_p11 = scmp.ne.s32.totalorder (!%p190_p9), %s793_s6, %s599_s10 }
  0x15   : > { %s217_s11 = scalar_select %p216_p10, %s717_s22, 1  ;;  %529 = vmatpush3.bf16.msra.mxu1 %v590_v5 }
  0x16   : > { %530 = vmatprep.subr.bf16.mxu1 %v663_v1  ;;  %s411_s22 = scalar_lea.sflag [#allocation3], %s213_s16  ;;  %p601_p12 = pnand %p600_p11, %p734_p5 }
  0x17   : > { %s488_s12 = sshll.u32 %s217_s11, 2  ;;  %s665_s11 = smov [#allocation2]  }
  0x18   : > { %s219_s15 = scalar_lea.vmem %s834_s0, %s488_s12  ;;  %p602_p13 = pneg %p601_p12 }
  0x19   : > { %v221_v4 = vld [vmem:[%s219_s15] sm:$0xf]  ;;  %531 = vmatpush3.bf16.msra.mxu1 %v591_v6  ;;  %s603_s12 = sshll.u32 %s665_s11, 4  ;;  %s604_s12 = int_to_ptr.vmem [resolvable:$false] %s603_s12 }
  0x1a   : > { %523 = vmatmul.mubr.msk.bf16.vlgmr.msra.gmra.mrb[0].mxu0 %vm245_vm1, %v221_v4  ;;  %532 = vmatprep.subr.bf16.mxu1 %v663_v1  ;;  %s605_s13 = scalar_lea.vmem %s604_s12, 256  ;;  %p606_p0 = scmp.lt.s32.totalorder %s793_s6, %s604_s12 }
  0x1b   : > { %p607_p1 = scmp.lt.s32.totalorder %s605_s13, %s599_s10 }
  0x1d   : > { %533 = vmatpush3.bf16.msra.mxu1 %v592_v7  ;;  %p608_p2 = por %p607_p1, %p606_p0 }
  0x1e   : > { %534 = vmatprep.subr.bf16.mxu1 %v663_v1 }
  0x1f   : > { %p609_p3 = pnand %p608_p2, %p602_p13 }
  0x21   : > { %535 = vmatpush3.bf16.msra.mxu1 %v593_v8 }
  0x22   : > { %536 = vmatprep.subr.bf16.mxu1 %v663_v1 }
  0x25   : > { %537 = vmatpush3.bf16.msra.mxu1 %v594_v9 }
  0x26   : > { %538 = vmatprep.subr.bf16.mxu1 %v663_v1 }
  0x29   : > { %539 = vmatpush3.bf16.msra.mxu1 %v595_v10 }
  0x2a   : > { %540 = vmatprep.subr.bf16.mxu1 %v663_v1 }
  0x2d   : > { %541 = vmatpush3.bf16.msra.mxu1 %v596_v11 }
  0xed   : > { %v283_v13 = vpop.f32.mrb[0].mxu0 }
  0xee   : > { %v284_v14 = vadd.f32 %v489_v12, %v283_v13  ;;  %v524_v15 = vpop.f32.mrb[1].mxu0 }
  0xef   : > { %v286_v16 = vpop.f32.mrb[2].mxu0 }
  0xf0   : > { %v289_v17 = vmul.f32 %v284_v14, %v284_v14  ;;  %v525_v18 = vpop.f32.mrb[3].mxu0  ;;  %v294_v23 = vmul.f32 0.5, %v284_v14 }
  0xf2   : > { %v290_v19 = vmul.f32 0.035677407, %v289_v17 }
  0xf4   : > { %v291_v20 = vadd.f32 0.7978846, %v290_v19 }
  0xf6   : > { %v292_v21 = vmul.f32 %v291_v20, %v284_v14 }
  0xf8   : > { %597 = vtanh.f32 %v292_v21 }
 0x102   : > { %v598_v22 = vpop.eup %597 }
 0x103   : > { %v295_v24 = vadd.f32 1.0, %v598_v22 }
 0x105   : > { %v296_v25 = vmul.f32 %v295_v24, %v294_v23 }
 0x107   : > { %v297_v26 = vpack.c.bf16 %v296_v25, %v296_v25 }
 0x109   : > { %543 = vmatmul.mubr.bf16.vlgmr.msra.gmra.mrb[0].mxu1 %v297_v26 }
 0x1dc   : > { %v403_v28 = vpop.f32.mrb[0].mxu1 }
 0x1dd   : > { %v404_v29 = vadd.f32 %v493_v27, %v403_v28  ;;  %v544_v30 = vpop.f32.mrb[1].mxu1 }
 0x1de   : > { %v406_v31 = vpop.f32.mrb[2].mxu1 }
 0x1df   : > { %v545_v32 = vpop.f32.mrb[3].mxu1  ;;  %409 = vst.msk [vmem:[%s215_s30] sm:$0xff] %vm245_vm1, %v404_v29 }
 0x1e0   : > { %612 = shalt.err (!%p609_p3)
}
 0x1e1   : > { %s613_s14 = scalar_lea.hbm %s791_s9, 128  ;;  %s617_s17 = scalar_lea.hbm %s839_s5, 256 }
 0x1e2   : > { %p614_p4 = scmp.ne.s32.totalorder %s791_s9, %s613_s14  ;;  %p618_p9 = scmp.lt.u32.totalorder %s791_s9, %s839_s5 }
 0x1e3   : > { %p619_p10 = scmp.lt.u32.totalorder %s617_s17, %s613_s14  ;;  %p621_p12 = scmp.lt.u32.totalorder %s613_s14, %s791_s9 }
 0x1e4   : > { %p615_p7 = pnand %p614_p4, %p734_p5 }
 0x1e5   : > { %p620_p11 = por %p619_p10, %p618_p9 }
 0x1e6   : > { %p616_p8 = pneg %p615_p7 }
 0x1e7   : > { %p622_p13 = por %p621_p12, %p620_p11 }
 0x1e9   : > { %p623_p0 = pnand %p622_p13, %p616_p8 }
 0x1eb   : > { %626 = shalt.err (!%p623_p0)
}
 0x1ec   : > { %546 = dma.vmem_to_hbm [thread:$0]  (%p734_p5), %s793_s6, 128, %s791_s9, %s411_s22  }
 0x1ed PF: > { %p552_p1 = scmp.ge.s32.totalorder %s661_s21, 2  ;;  %s436_s26 = sand.u32 1, %s649_s18  }
 0x1ee   : > { %s437_s30 = scalar_lea.sflag [#allocation3], %s436_s26 }
 0x1ef   : > { %p549_p2 = pnand %p552_p1, %p738_p6 }
 0x1f1   : > { %644 = dma.done.wait (!%p549_p2), %s437_s30, 128  }
 0x1f2   : > { %646 = vsyncadd (!%p549_p2), %s437_s30, 4294967168  ;;  %p15_p3 = scmp.ge.s32.totalorder %s721_s24, 4   ;;  %s842_s18 = smov %s653_s19 }
 0x1f3   : > { %s843_s19 = smov %s657_s20  ;;  %s844_s20 = smov %s732_s27 }
 0x1f4   : > { %s845_s21 = smov %s721_s24  ;;  %17 = sbr.rel (!%p15_p3) target bundleno = 3 (0x3), region = 75 }
 0x1fb   :  { %442 = vsyncpa [#allocation3], 1 }
 0x1fc   :  { %444 = vsyncpa [#allocation3 + $0x1], 1 }

// kernel: tpu_custom_call.1
= control target key start
LH: loop header
LB: loop body
LE: loop exit
PB: predicated region body
PF: predicated region fallthrough
CT: control target
= control target key end

     0   :  { %10 = vsyncpa [#allocation3], 0  ;;  %s834_s0 = inlined_call_operand.vmem [shape: bf16[16,32], index: 0, kind: input, shape index: {}]   ;;  %s835_s1 = inlined_call_operand.vmem [shape: bf16[32,128], index: 1, kind: input, shape index: {}]   ;;  %s836_s2 = inlined_call_operand.vmem [shape: f32[1,128], index: 2, kind: input, shape index: {}]   ;;  %s837_s3 = inlined_call_operand.vmem [shape: bf16[128,32], index: 3, kind: input, shape index: {}]   ;;  %s838_s4 = inlined_call_operand.vmem [shape: f32[1,32], index: 4, kind: input, shape index: {}]   ;;  %s839_s5 = inlined_call_operand.hbm [shape: f32[16,32], index: 5, kind: output, shape index: {}]  }
   0x1   :  { %12 = vsyncpa [#allocation3 + $0x1], 0  ;;  %s696_s18 = smov 0   ;;  %s698_s19 = smov 0  }
   0x2   :  { %s700_s20 = smov 0   ;;  %s702_s21 = smov 0  }
   0x3 LB: > { %s717_s22 = sadd.s32 4294967295, %s661_s21   ;;  %s483_s23 = sadd.s32 4294967294, %s661_s21   ;;  %s661_s21 = sphi %s702_s21, %s845_s21   ;;  %s657_s20 = sphi %s700_s20, %s844_s20   ;;  %s653_s19 = sphi %s698_s19, %s843_s19   ;;  %s649_s18 = sphi %s696_s18, %s842_s18  }
   0x4   : > { %s721_s24 = sadd.s32 1, %s661_s21   ;;  %s135_s25 = sadd.s32 1, %s657_s20 }
   0x5   : > { %s132_s26 = ssub.s32 %s661_s21, %s721_s24  ;;  %p145_p0 = scmp.ne.s32.totalorder %s657_s20, %s653_s19 }
   0x6   : > { %p133_p1 = scmp.eq.s32.totalorder %s132_s26, 0  ;;  %p146_p2 = scmp.eq.s32.totalorder %s717_s22, 1 }
   0x7   : > { %p151_p3 = scmp.ne.s32.totalorder %s653_s19, %s649_s18  ;;  %p152_p4 = scmp.eq.s32.totalorder %s483_s23, 1 }
   0x8   : > { %s732_s27 = scalar_select %p133_p1, %s657_s20, %s135_s25  }
   0x9   : > { %p734_p5 = por %p146_p2, %p145_p0  ;;  %p738_p6 = por %p152_p4, %p151_p3 }
   0xa   : > { %p486_p7 = scmp.ge.s32.totalorder %s661_s21, 1  ;;  %p189_p8 = scmp.lt.s32.totalorder %s661_s21, 3 }
   0xc   : > { %p190_p9 = pnand %p486_p7, %p189_p8 }
   0xd   : > { %v587_v0 = vld [vmem:[%s835_s1] sm:$0xff] (!%p190_p9)   ;;  %v663_v1 = vmov (!%p190_p9), 0.0   ;;  %v588_v2 = vld [vmem:[%s835_s1 + $0x8] sm:$0xff] (!%p190_p9)   ;;  %vm664_vm0 = vmmov (!%p190_p9), 0   ;;  %p216_p10 = scmp.lt.s32.totalorder (!%p190_p9), %s717_s22, 1  ;;  %vm245_vm1 = vcmask (!%p190_p9), 261120  }
   0xe   : > { %193 = sbr.rel (%p190_p9) target bundleno = 493 (0x1ed), region = 40  ;;  %518 = vmatprep.subr.bf16.mxu0 (!%p190_p9), %v663_v1  ;;  %526 = vmatprep.subr.bf16.mxu1 (!%p190_p9), %v663_v1  ;;  %v589_v3 = vld [vmem:[%s837_s3] sm:$0xff] (!%p190_p9)   ;;  %v590_v5 = vld [vmem:[%s837_s3 + $0x8] sm:$0xff] (!%p190_p9)   ;;  %v591_v6 = vld [vmem:[%s837_s3 + $0x10] sm:$0xff] (!%p190_p9)   ;;  %s213_s16 = sand.u32 (!%p190_p9), 1, %s653_s19  }
   0xf   : > { %519 = vmatpush3.bf16.msra.mxu0 (!%p190_p9), %v587_v0  ;;  %522 = vmatprep.mubr.msk.bf16.mxu0 (!%p190_p9), %vm664_vm0, %v663_v1  ;;  %v592_v7 = vld [vmem:[%s837_s3 + $0x18] sm:$0xff] (!%p190_p9)   ;;  %v593_v8 = vld [vmem:[%s837_s3 + $0x20] sm:$0xff] (!%p190_p9)   ;;  %v594_v9 = vld [vmem:[%s837_s3 + $0x28] sm:$0xff] (!%p190_p9)   ;;  %s487_s17 = sshll.u32 (!%p190_p9), %s213_s16, 3  ;;  %s503_s26 = sshll.u32 (!%p190_p9), %s717_s22, 7 }
  0x10   : > { %520 = vmatprep.subr.bf16.mxu0 (!%p190_p9), %v663_v1  ;;  %542 = vmatprep.mubr.msk.bf16.mxu1 (!%p190_p9), %vm664_vm0, %v663_v1  ;;  %v595_v10 = vld [vmem:[%s837_s3 + $0x30] sm:$0xff] (!%p190_p9)   ;;  %v596_v11 = vld [vmem:[%s837_s3 + $0x38] sm:$0xff] (!%p190_p9)   ;;  %v489_v12 = vld [vmem:[%s836_s2] ss:$0 sm:$0xff] (!%p190_p9)  ;;  %s215_s30 = scalar_lea.vmem (!%p190_p9), [#allocation2], %s487_s17  ;;  %s791_s9 = scalar_lea.hbm (!%p190_p9), %s839_s5, %s503_s26 }
  0x11   : > { %527 = vmatpush3.bf16.msra.mxu1 (!%p190_p9), %v589_v3  ;;  %v493_v27 = vld [vmem:[%s838_s4] ss:$0 sm:$0xff] (!%p190_p9)  ;;  %s424_s6 = sshll.u32 (!%p190_p9), %s215_s30, 4  ;;  %s793_s6 = int_to_ptr.vmem [resolvable:$true] %s424_s6 }
  0x12   : > { %528 = vmatprep.subr.bf16.mxu1 (!%p190_p9), %v663_v1  ;;  %s599_s10 = scalar_lea.vmem (!%p190_p9), %s793_s6, 128 }
  0x13   : > { %521 = vmatpush3.bf16.msra.mxu0 (!%p190_p9), %v588_v2  ;;  %p600_p11 = scmp.ne.s32.totalorder (!%p190_p9), %s793_s6, %s599_s10 }
  0x15   : > { %s217_s11 = scalar_select %p216_p10, %s717_s22, 1  ;;  %529 = vmatpush3.bf16.msra.mxu1 %v590_v5 }
  0x16   : > { %530 = vmatprep.subr.bf16.mxu1 %v663_v1  ;;  %s411_s22 = scalar_lea.sflag [#allocation3], %s213_s16  ;;  %p601_p12 = pnand %p600_p11, %p734_p5 }
  0x17   : > { %s488_s12 = sshll.u32 %s217_s11, 2  ;;  %s665_s11 = smov [#allocation2]  }
  0x18   : > { %s219_s15 = scalar_lea.vmem %s834_s0, %s488_s12  ;;  %p602_p13 = pneg %p601_p12 }
  0x19   : > { %v221_v4 = vld [vmem:[%s219_s15] sm:$0xf]  ;;  %531 = vmatpush3.bf16.msra.mxu1 %v591_v6  ;;  %s603_s12 = sshll.u32 %s665_s11, 4  ;;  %s604_s12 = int_to_ptr.vmem [resolvable:$false] %s603_s12 }
  0x1a   : > { %523 = vmatmul.mubr.msk.bf16.vlgmr.msra.gmra.mrb[0].mxu0 %vm245_vm1, %v221_v4  ;;  %532 = vmatprep.subr.bf16.mxu1 %v663_v1  ;;  %s605_s13 = scalar_lea.vmem %s604_s12, 256  ;;  %p606_p0 = scmp.lt.s32.totalorder %s793_s6, %s604_s12 }
  0x1b   : > { %p607_p1 = scmp.lt.s32.totalorder %s605_s13, %s599_s10 }
  0x1d   : > { %533 = vmatpush3.bf16.msra.mxu1 %v592_v7  ;;  %p608_p2 = por %p607_p1, %p606_p0 }
  0x1e   : > { %534 = vmatprep.subr.bf16.mxu1 %v663_v1 }
  0x1f   : > { %p609_p3 = pnand %p608_p2, %p602_p13 }
  0x21   : > { %535 = vmatpush3.bf16.msra.mxu1 %v593_v8 }
  0x22   : > { %536 = vmatprep.subr.bf16.mxu1 %v663_v1 }
  0x25   : > { %537 = vmatpush3.bf16.msra.mxu1 %v594_v9 }
  0x26   : > { %538 = vmatprep.subr.bf16.mxu1 %v663_v1 }
  0x29   : > { %539 = vmatpush3.bf16.msra.mxu1 %v595_v10 }
  0x2a   : > { %540 = vmatprep.subr.bf16.mxu1 %v663_v1 }
  0x2d   : > { %541 = vmatpush3.bf16.msra.mxu1 %v596_v11 }
  0xed   : > { %v283_v13 = vpop.f32.mrb[0].mxu0 }
  0xee   : > { %v284_v14 = vadd.f32 %v489_v12, %v283_v13  ;;  %v524_v15 = vpop.f32.mrb[1].mxu0 }
  0xef   : > { %v286_v16 = vpop.f32.mrb[2].mxu0 }
  0xf0   : > { %v289_v17 = vmul.f32 %v284_v14, %v284_v14  ;;  %v525_v18 = vpop.f32.mrb[3].mxu0  ;;  %v294_v23 = vmul.f32 0.5, %v284_v14 }
  0xf2   : > { %v290_v19 = vmul.f32 0.035677407, %v289_v17 }
  0xf4   : > { %v291_v20 = vadd.f32 0.7978846, %v290_v19 }
  0xf6   : > { %v292_v21 = vmul.f32 %v291_v20, %v284_v14 }
  0xf8   : > { %597 = vtanh.f32 %v292_v21 }
 0x102   : > { %v598_v22 = vpop.eup %597 }
 0x103   : > { %v295_v24 = vadd.f32 1.0, %v598_v22 }
 0x105   : > { %v296_v25 = vmul.f32 %v295_v24, %v294_v23 }
 0x107   : > { %v297_v26 = vpack.c.bf16 %v296_v25, %v296_v25 }
 0x109   : > { %543 = vmatmul.mubr.bf16.vlgmr.msra.gmra.mrb[0].mxu1 %v297_v26 }
 0x1dc   : > { %v403_v28 = vpop.f32.mrb[0].mxu1 }
 0x1dd   : > { %v404_v29 = vadd.f32 %v493_v27, %v403_v28  ;;  %v544_v30 = vpop.f32.mrb[1].mxu1 }
 0x1de   : > { %v406_v31 = vpop.f32.mrb[2].mxu1 }
 0x1df   : > { %v545_v32 = vpop.f32.mrb[3].mxu1  ;;  %409 = vst.msk [vmem:[%s215_s30] sm:$0xff] %vm245_vm1, %v404_v29 }
 0x1e0   : > { %612 = shalt.err (!%p609_p3)
}
 0x1e1   : > { %s613_s14 = scalar_lea.hbm %s791_s9, 128  ;;  %s617_s17 = scalar_lea.hbm %s839_s5, 256 }
 0x1e2   : > { %p614_p4 = scmp.ne.s32.totalorder %s791_s9, %s613_s14  ;;  %p618_p9 = scmp.lt.u32.totalorder %s791_s9, %s839_s5 }
 0x1e3   : > { %p619_p10 = scmp.lt.u32.totalorder %s617_s17, %s613_s14  ;;  %p621_p12 = scmp.lt.u32.totalorder %s613_s14, %s791_s9 }
 0x1e4   : > { %p615_p7 = pnand %p614_p4, %p734_p5 }
 0x1e5   : > { %p620_p11 = por %p619_p10, %p618_p9 }
 0x1e6   : > { %p616_p8 = pneg %p615_p7 }
 0x1e7   : > { %p622_p13 = por %p621_p12, %p620_p11 }
 0x1e9   : > { %p623_p0 = pnand %p622_p13, %p616_p8 }
 0x1eb   : > { %626 = shalt.err (!%p623_p0)
}
 0x1ec   : > { %546 = dma.vmem_to_hbm [thread:$0]  (%p734_p5), %s793_s6, 128, %s791_s9, %s411_s22  }
 0x1ed PF: > { %p552_p1 = scmp.ge.s32.totalorder %s661_s21, 2  ;;  %s436_s26 = sand.u32 1, %s649_s18  }
 0x1ee   : > { %s437_s30 = scalar_lea.sflag [#allocation3], %s436_s26 }
 0x1ef   : > { %p549_p2 = pnand %p552_p1, %p738_p6 }
 0x1f1   : > { %644 = dma.done.wait (!%p549_p2), %s437_s30, 128  }
 0x1f2   : > { %646 = vsyncadd (!%p549_p2), %s437_s30, 4294967168  ;;  %p15_p3 = scmp.ge.s32.totalorder %s721_s24, 4   ;;  %s842_s18 = smov %s653_s19 }
 0x1f3   : > { %s843_s19 = smov %s657_s20  ;;  %s844_s20 = smov %s732_s27 }
 0x1f4   : > { %s845_s21 = smov %s721_s24  ;;  %17 = sbr.rel (!%p15_p3) target bundleno = 3 (0x3), region = 75 }
 0x1fb   :  { %442 = vsyncpa [#allocation3], 1 }
 0x1fc   :  { %444 = vsyncpa [#allocation3 + $0x1], 1 }

</bundles_post_ra>
